<compile_context>
chip_gen: v6e
topology: v6e:2x2x1
jax: 0.10.0
libtpu: 0.0.40
codegen_flags: <defaults>
</compile_context>

<pallas_src>
import math

import jax
import jax.numpy as jnp
from jax.experimental import pallas as pl
from jax.experimental.pallas import tpu as pltpu


# Candidate lane-dense widths (multiples of the 128-lane vreg axis), widest
# first.  A wide, lane-dense output block gives unmasked wide vst and few,
# large DMA descriptors instead of many 128-lane strips.
_WIDTHS = (8192, 4096, 2048, 1024, 512, 256, 128)

# Per-block byte budget.  Input + output are each double-buffered, so the
# pipeline holds ~4x this in VMEM (~8 MiB total) — comfortably inside the
# default scoped VMEM on v5e (16 MiB), v6e (32 MiB) and v7x (32 MiB scoped /
# 64 MiB physical), while being large enough (512x1024 f32) to sit near the
# measured ~85% of HBM copy roofline.
_BLOCK_BYTES = 2 * 1024 * 1024


def _copy_kernel(x_ref, o_ref):
    # Identity copy of one (tile_rows, width) VMEM tile.
    o_ref[...] = x_ref[...]


def _resolve_view_shape(shape, total):
    """Resolve a single -1 and validate divisibility (torch .view semantics)."""
    shape = list(shape)
    if shape.count(-1) > 1:
        raise ValueError("view(): only one dimension can be inferred (-1)")
    if -1 in shape:
        known = math.prod(s for s in shape if s != -1)
        if known == 0 or total % known != 0:
            raise ValueError(
                f"view(): shape {tuple(shape)} is invalid for input of size {total}")
        shape[shape.index(-1)] = total // known
    if math.prod(shape) != total:
        raise ValueError(
            f"view(): shape {tuple(shape)} is invalid for input of size {total}")
    return tuple(shape)


def _streaming_copy(x2d, tile_rows, width):
    rows = x2d.shape[0]
    grid = (pl.cdiv(rows, tile_rows),)  # ragged last block handled by Pallas
    return pl.pallas_call(
        _copy_kernel,
        out_shape=jax.ShapeDtypeStruct((rows, width), x2d.dtype),
        grid_spec=pltpu.PrefetchScalarGridSpec(
            num_scalar_prefetch=0,
            grid=grid,
            in_specs=[pl.BlockSpec((tile_rows, width), lambda i: (i, 0))],
            out_specs=pl.BlockSpec((tile_rows, width), lambda i: (i, 0)),
        ),
        # "parallel" lets the grid axis shard across the 2 TensorCores on v7x.
        compiler_params=pltpu.CompilerParams(
            dimension_semantics=("parallel",)),
    )(x2d)


def pallas_reshape(x, *shape):
    """Equivalent of torch.Tensor.view(*shape) for a (contiguous) array.

    NOTE: non-contiguous torch semantics (where .view() would raise) are not
    reproduced — JAX arrays are always logically contiguous here.
    """
    total = int(x.size)
    out_shape = _resolve_view_shape(shape, total)

    if total == 0:
        return jnp.reshape(x, out_shape)

    # Pick the widest lane width that divides the flat size exactly, so no
    # jnp.pad / trailing-slice round trip (2 extra full HBM passes) is needed.
    width = next((w for w in _WIDTHS if total % w == 0), None)
    if width is None:
        # Flat size is not a multiple of 128 lanes.  Reshape is metadata-only
        # in XLA (exactly like .view on contiguous data), so take the
        # zero-copy path rather than padding into a copy kernel.
        return jnp.reshape(x, out_shape)

    rows = total // width
    itemsize = jnp.dtype(x.dtype).itemsize
    # Packed-native sublane minimum: 8 (4-byte) / 16 (2-byte) / 32 (1-byte).
    min_sublanes = max(8, 32 // itemsize)
    if rows <= min_sublanes:
        tile_rows = rows  # block dim == full array dim: always a legal tiling
    else:
        budget_rows = max(1, _BLOCK_BYTES // (width * itemsize))
        tile_rows = min(rows, budget_rows)
        tile_rows = max(min_sublanes, (tile_rows // min_sublanes) * min_sublanes)

    x2d = jnp.reshape(x, (rows, width))       # metadata-only
    out2d = _streaming_copy(x2d, tile_rows, width)
    return jnp.reshape(out2d, out_shape)      # metadata-only


class Reshape:
    """JAX/Pallas analogue of the PyTorch Reshape module."""

    def __init__(self, *shape):
        self.shape = shape

    def __call__(self, x):
        return pallas_reshape(x, *self.shape)


if __name__ == "__main__":
    key = jax.random.PRNGKey(0)
    k0, k1 = jax.random.split(key)

    # Small NCHW-ish input: batch=2, channels=4, spatial=16x16.
    x = jax.random.normal(k0, (2, 4, 16, 16), dtype=jnp.float32)

    # (2, 4, 16, 16) -> (2, 4, 256), matching x.view(2, 4, -1).
    module = Reshape(2, 4, -1)
    y = jax.block_until_ready(module(x))
    ref = x.reshape(2, 4, 256)
    assert y.shape == (2, 4, 256)
    assert y.dtype == x.dtype
    assert bool(jnp.array_equal(y, ref))

    # bf16 path (16-sublane packed-tile minimum) through the same kernel.
    xb = jax.random.normal(k1, (2, 8, 32), dtype=jnp.bfloat16)
    yb = jax.block_until_ready(Reshape(-1, 32)(xb))
    assert yb.shape == (16, 32)
    assert bool(jnp.array_equal(yb, xb.reshape(16, 32)))

    # Non-128-divisible flat size exercises the zero-copy metadata fallback.
    xo = jnp.arange(3 * 5 * 7, dtype=jnp.float32).reshape(3, 5, 7)
    yo = jax.block_until_ready(Reshape(5, -1)(xo))
    assert bool(jnp.array_equal(yo, xo.reshape(5, 21)))

    print("KERNEL_OK")
</pallas_src>

<mosaic_0001>
module attributes {stable_mosaic.version = 11 : i64} {
  func.func @_copy_kernel(%arg0: i32, %arg1: memref<1x2048xf32, #tpu.memory_space<vmem>>, %arg2: memref<1x2048xf32, #tpu.memory_space<vmem>>) attributes {dimension_semantics = [#tpu.dimension_semantics<parallel>], iteration_bounds = array<i64: 1>, scalar_prefetch = 0 : i64, scratch_operands = 0 : i64, tpu.core_type = #tpu.core_type<tc>, window_params = [{transform_indices = @transform_0, window_bounds = array<i64: 1, 2048>}, {transform_indices = @transform_1, window_bounds = array<i64: 1, 2048>}]} {
    %c0 = arith.constant 0 : index
    %c0_0 = arith.constant 0 : index
    %0 = vector.load %arg1[%c0, %c0_0] : memref<1x2048xf32, #tpu.memory_space<vmem>>, vector<1x2048xf32>
    %c0_1 = arith.constant 0 : index
    %c0_2 = arith.constant 0 : index
    %1 = vector.load %arg2[%c0_1, %c0_2] : memref<1x2048xf32, #tpu.memory_space<vmem>>, vector<1x2048xf32>
    tpu.vector_store %arg2[%c0_1, %c0_2], %0 {strides = array<i32>} : memref<1x2048xf32, #tpu.memory_space<vmem>>, vector<1x2048xf32>,
    return
  }
  func.func @transform_0(%arg0: i32) -> (i32, i32) {
    %c0_i32 = arith.constant 0 : i32
    %c0_i32_0 = arith.constant 0 : i32
    return %arg0, %c0_i32 : i32, i32
  }
  func.func @transform_1(%arg0: i32) -> (i32, i32) {
    %c0_i32 = arith.constant 0 : i32
    %c0_i32_0 = arith.constant 0 : i32
    return %arg0, %c0_i32 : i32, i32
  }
}

</mosaic_0001>

<bundles_post_ra>
// kernel: tpu_custom_call.1
= control target key start
LH: loop header
LB: loop body
LE: loop exit
PB: predicated region body
PF: predicated region fallthrough
CT: control target
= control target key end

     0   :  { %6 = vsyncpa [#allocation3], 0  ;;  %s104_s0 = inlined_call_operand.hbm [shape: f32[1,2048], index: 0, kind: input, shape index: {}]   ;;  %s105_s1 = inlined_call_operand.hbm [shape: f32[1,2048], index: 1, kind: output, shape index: {}]  }
   0x1   :  { %7 = vsyncpa [#allocation4], 0  ;;  %s86_s6 = smov [#allocation2]  }
   0x2   :  { %s14_s7 = sshll.u32 %s86_s6, 4  ;;  %s15_s7 = int_to_ptr.vmem [resolvable:$true] %s14_s7 }
   0x3   :  { %s50_s8 = scalar_lea.vmem %s15_s7, 256  ;;  %p55_p1 = scmp.lt.s32.totalorder %s15_s7, %s15_s7 }
   0x4   :  { %p51_p0 = scmp.ne.s32.totalorder %s15_s7, %s50_s8  ;;  %p56_p2 = scmp.lt.s32.totalorder %s50_s8, %s50_s8 }
   0x6   :  { %p57_p3 = por %p56_p2, %p55_p1 }
   0x8   :  { %p58_p4 = pnand %p57_p3, %p51_p0 }
   0xa   :  { %61 = shalt.err (!%p58_p4)
}
   0xb   :  { %17 = dma.hbm_to_vmem [thread:$0]  %s104_s0, 256, %s15_s7, [#allocation3]  }
   0xc   :  { %82 = dma.done.wait [#allocation3], 256  }
   0xd   :  { %83 = vsyncadd [#allocation3], 4294967040  ;;  %s87_s11 = smov [#allocation5]   ;;  %v21_v0 = vld [vmem:[#allocation2] sm:$0xff]  ;;  %v22_v1 = vld [vmem:[#allocation2 + $0x8] sm:$0xff] }
   0xe   :  { %s31_s12 = sshll.u32 %s87_s11, 4  ;;  %23 = vst [vmem:[#allocation5] sm:$0xff] %v21_v0  ;;  %24 = vst [vmem:[#allocation5 + $0x8] sm:$0xff] %v22_v1  ;;  %s32_s12 = int_to_ptr.vmem [resolvable:$true] %s31_s12 }
   0xf   :  { %s62_s13 = scalar_lea.vmem %s32_s12, 256  ;;  %p67_p6 = scmp.lt.s32.totalorder %s32_s12, %s32_s12 }
  0x10   :  { %p63_p5 = scmp.ne.s32.totalorder %s32_s12, %s62_s13  ;;  %p68_p7 = scmp.lt.s32.totalorder %s62_s13, %s62_s13 }
  0x12   :  { %p69_p8 = por %p68_p7, %p67_p6 }
  0x14   :  { %p70_p9 = pnand %p69_p8, %p63_p5 }
  0x16   :  { %73 = shalt.err (!%p70_p9)
}
  0x17   :  { %34 = dma.vmem_to_hbm [thread:$0]  %s32_s12, 256, %s105_s1, [#allocation4]  }
  0x18   :  { %84 = dma.done.wait [#allocation4], 256  }
  0x19   :  { %85 = vsyncadd [#allocation4], 4294967040 }
  0x1a   :  { %38 = vsyncpa [#allocation3], 1 }
  0x1b   :  { %39 = vsyncpa [#allocation4], 1 }

</bundles_post_ra>
